<compile_context>
chip_gen: v5e
topology: v5e:2x2
jax: 0.10.0
libtpu: 0.0.40
codegen_flags: <defaults>
</compile_context>

<pallas_src>
import jax
import jax.numpy as jnp
from jax.experimental import pallas as pl
from jax.experimental.pallas import tpu as pltpu

EPS = 1e-5


def _feature_mixing_kernel(x_ref, scale_ref, shift_ref,
                           w1_ref, b1_ref, w2_ref, wp_ref, bc_ref, o_ref):
    xb = x_ref[...]                                    # (nb, S, Cin) matmul dtype
    nb, s, cin = xb.shape
    mm_dt = w1_ref.dtype

    # Fold batch & time into the matmul M dimension (S % 8 == 0 -> layout-free).
    x2 = xb.reshape(nb * s, cin)

    # TimeBatchNorm2d (eval) folded to a single affine, computed in f32 and
    # broadcast over the batch dim, then cast back to the matmul dtype.
    xn = xb.astype(jnp.float32) * scale_ref[...] + shift_ref[...]   # (nb, S, Cin)
    xn2 = xn.reshape(nb * s, cin).astype(mm_dt)

    # Projection branch + combined bias (bp + b2) accumulated first so only a
    # single (M, Cout) f32 accumulator stays live through the epilogue.
    acc = jnp.dot(x2, wp_ref[...], preferred_element_type=jnp.float32)
    acc = acc + bc_ref[...]

    # fc1 -> relu -> fc2, accumulated into the same buffer.
    h = jnp.dot(xn2, w1_ref[...], preferred_element_type=jnp.float32) + b1_ref[...]
    h = jnp.maximum(h, 0.0).astype(mm_dt)
    acc = acc + jnp.dot(h, w2_ref[...], preferred_element_type=jnp.float32)

    # Direct (nb, S, Cout) store: no column padding, no post-call slice pass.
    o_ref[...] = acc.reshape(nb, s, acc.shape[-1]).astype(o_ref.dtype)


def feature_mixing(x, params, *, matmul_dtype=jnp.bfloat16, target_rows=2048):
    """x: (N, S, Cin) float32. Returns (N, S, Cout) in x.dtype."""
    N, S, Cin = x.shape
    FF = params["w1"].shape[1]
    Cout = params["w2"].shape[1]

    # ---- wrapper-side folding (done once, outside the kernel) -------------
    scale = params["gamma"] * jax.lax.rsqrt(params["rv"] + EPS)     # (S, Cin)
    shift = params["beta"] - params["rm"] * scale                   # (S, Cin)
    bcomb = (params["bp"] + params["b2"]).astype(jnp.float32)       # (1, Cout)

    w1 = params["w1"].astype(matmul_dtype)
    w2 = params["w2"].astype(matmul_dtype)
    wp = params["wp"].astype(matmul_dtype)
    b1 = params["b1"].astype(jnp.float32)

    # Halve x HBM traffic: matmul operands are bf16 anyway (use
    # matmul_dtype=jnp.float32 to recover exact f32 numerics end-to-end).
    x_mm = x.astype(matmul_dtype)

    # ---- batch tile selection ---------------------------------------------
    # Aim for ~target_rows matmul rows per grid step, but keep >=2 grid steps
    # whenever the batch can be split so v7x's 2 TensorCores both get work
    # (negligible cost on single-TC v5e/v6e).  nb divides N -> full blocks.
    want = max(1, target_rows // max(S, 1))
    nb = min(N, want)
    if N >= 2:
        nb = min(nb, max(1, N // 2))
    while N % nb:
        nb -= 1
    grid = (N // nb,)

    # ---- explicit VMEM budget (so bigger tiles never hit scoped default) --
    mmi = jnp.dtype(matmul_dtype).itemsize
    rows = nb * S
    block_bytes = 2 * (rows * Cin * mmi + rows * Cout * 4)          # x + out (dbl-buf)
    const_bytes = 2 * (2 * S * Cin * 4
                       + (Cin * FF + FF * Cout + Cin * Cout) * mmi
                       + (FF + Cout) * 4)
    inter_bytes = rows * (2 * Cin * 4 + FF * (4 + mmi) + 2 * Cout * 4)
    vmem_bytes = int(1.5 * (block_bytes + const_bytes + inter_bytes)) + (2 << 20)
    vmem_bytes = min(max(vmem_bytes, 32 << 20), 48 << 20)

    full2d = lambda i: (0, 0)

    out = pl.pallas_call(
        _feature_mixing_kernel,
        out_shape=jax.ShapeDtypeStruct((N, S, Cout), x.dtype),
        grid_spec=pltpu.PrefetchScalarGridSpec(
            num_scalar_prefetch=0,
            grid=grid,
            in_specs=[
                pl.BlockSpec((nb, S, Cin), lambda i: (i, 0, 0)),   # x (matmul dtype)
                pl.BlockSpec((S, Cin), full2d),                    # BN scale (f32)
                pl.BlockSpec((S, Cin), full2d),                    # BN shift (f32)
                pl.BlockSpec((Cin, FF), full2d),                   # W1
                pl.BlockSpec((1, FF), full2d),                     # b1
                pl.BlockSpec((FF, Cout), full2d),                  # W2
                pl.BlockSpec((Cin, Cout), full2d),                 # Wp
                pl.BlockSpec((1, Cout), full2d),                   # bp + b2
            ],
            out_specs=pl.BlockSpec((nb, S, Cout), lambda i: (i, 0, 0)),
        ),
        compiler_params=pltpu.CompilerParams(
            dimension_semantics=("parallel",),
            vmem_limit_bytes=vmem_bytes),
    )(x_mm, scale, shift, w1, b1, w2, wp, bcomb)

    return out


def feature_mixing_ref(x, p, matmul_dtype=jnp.bfloat16):
    """Pure-JAX reference with matched matmul precision (eval-mode semantics)."""
    dt = matmul_dtype
    scale = p["gamma"] * jax.lax.rsqrt(p["rv"] + EPS)
    shift = p["beta"] - p["rm"] * scale
    x_mm = x.astype(dt)
    xn = (x_mm.astype(jnp.float32) * scale + shift).astype(dt)
    proj = jnp.dot(x_mm, p["wp"].astype(dt), preferred_element_type=jnp.float32)
    h = jnp.dot(xn, p["w1"].astype(dt), preferred_element_type=jnp.float32) + p["b1"]
    h = jnp.maximum(h, 0.0).astype(dt)
    y = jnp.dot(h, p["w2"].astype(dt), preferred_element_type=jnp.float32)
    return proj + y + (p["bp"] + p["b2"])


if __name__ == "__main__":
    # Shapes consistent with the module:
    #   sequence_length=16, input_channels=32, output_channels=64, ff_dim=128
    N, S, Cin, Cout, FF = 4, 16, 32, 64, 128

    key = jax.random.PRNGKey(0)
    ks = jax.random.split(key, 12)
    f32 = jnp.float32

    x = jax.random.normal(ks[0], (N, S, Cin), dtype=f32)

    params = {
        # TimeBatchNorm2d over (S, Cin): per (time-step, channel) running
        # stats + affine (flat (S*C,) PyTorch stats reshaped row-major).
        "rm":    0.1 * jax.random.normal(ks[1], (S, Cin), dtype=f32),
        "rv":    1.0 + 0.1 * jax.random.uniform(ks[2], (S, Cin), dtype=f32),
        "gamma": 1.0 + 0.1 * jax.random.normal(ks[3], (S, Cin), dtype=f32),
        "beta":  0.1 * jax.random.normal(ks[4], (S, Cin), dtype=f32),
        # fc1: Linear(Cin, FF)  (stored transposed: (in, out))
        "w1": jax.random.normal(ks[5], (Cin, FF), dtype=f32) / jnp.sqrt(Cin),
        "b1": 0.1 * jax.random.normal(ks[6], (1, FF), dtype=f32),
        # fc2: Linear(FF, Cout)
        "w2": jax.random.normal(ks[7], (FF, Cout), dtype=f32) / jnp.sqrt(FF),
        "b2": 0.1 * jax.random.normal(ks[8], (1, Cout), dtype=f32),
        # projection: Linear(Cin, Cout)  (Cin != Cout)
        "wp": jax.random.normal(ks[9], (Cin, Cout), dtype=f32) / jnp.sqrt(Cin),
        "bp": 0.1 * jax.random.normal(ks[10], (1, Cout), dtype=f32),
    }

    out = feature_mixing(x, params)
    out = jax.block_until_ready(out)

    ref = feature_mixing_ref(x, params)
    assert out.shape == (N, S, Cout), out.shape
    assert out.dtype == x.dtype, out.dtype
    # bf16 matmul operands (f32 accumulation) on both sides -> modest tolerance.
    assert jnp.allclose(out, ref, atol=1e-2, rtol=1e-2), (
        float(jnp.max(jnp.abs(out - ref))))

    print("KERNEL_OK")
</pallas_src>

<mosaic_0001>
module attributes {stable_mosaic.version = 11 : i64} {
  func.func @_feature_mixing_kernel(%arg0: i32, %arg1: memref<2x16x32xbf16, #tpu.memory_space<vmem>>, %arg2: memref<16x32xf32, #tpu.memory_space<vmem>>, %arg3: memref<16x32xf32, #tpu.memory_space<vmem>>, %arg4: memref<32x128xbf16, #tpu.memory_space<vmem>>, %arg5: memref<1x128xf32, #tpu.memory_space<vmem>>, %arg6: memref<128x64xbf16, #tpu.memory_space<vmem>>, %arg7: memref<32x64xbf16, #tpu.memory_space<vmem>>, %arg8: memref<1x64xf32, #tpu.memory_space<vmem>>, %arg9: memref<2x16x64xf32, #tpu.memory_space<vmem>>) attributes {dimension_semantics = [#tpu.dimension_semantics<parallel>], iteration_bounds = array<i64: 2>, scalar_prefetch = 0 : i64, scratch_operands = 0 : i64, tpu.core_type = #tpu.core_type<tc>, window_params = [{transform_indices = @transform_0, window_bounds = array<i64: 2, 16, 32>}, {pipeline_mode = #tpu.pipeline_mode<synchronous>, transform_indices = @transform_1, window_bounds = array<i64: 16, 32>}, {pipeline_mode = #tpu.pipeline_mode<synchronous>, transform_indices = @transform_2, window_bounds = array<i64: 16, 32>}, {pipeline_mode = #tpu.pipeline_mode<synchronous>, transform_indices = @transform_3, window_bounds = array<i64: 32, 128>}, {pipeline_mode = #tpu.pipeline_mode<synchronous>, transform_indices = @transform_4, window_bounds = array<i64: 1, 128>}, {pipeline_mode = #tpu.pipeline_mode<synchronous>, transform_indices = @transform_5, window_bounds = array<i64: 128, 64>}, {pipeline_mode = #tpu.pipeline_mode<synchronous>, transform_indices = @transform_6, window_bounds = array<i64: 32, 64>}, {pipeline_mode = #tpu.pipeline_mode<synchronous>, transform_indices = @transform_7, window_bounds = array<i64: 1, 64>}, {transform_indices = @transform_8, window_bounds = array<i64: 2, 16, 64>}]} {
    %c0 = arith.constant 0 : index
    %c0_0 = arith.constant 0 : index
    %c0_1 = arith.constant 0 : index
    %0 = vector.load %arg1[%c0, %c0_0, %c0_1] : memref<2x16x32xbf16, #tpu.memory_space<vmem>>, vector<2x16x32xbf16>
    %1 = vector.shape_cast %0 : vector<2x16x32xbf16> to vector<32x32xbf16>
    %2 = arith.extf %0 : vector<2x16x32xbf16> to vector<2x16x32xf32>
    %c0_2 = arith.constant 0 : index
    %c0_3 = arith.constant 0 : index
    %3 = vector.load %arg2[%c0_2, %c0_3] : memref<16x32xf32, #tpu.memory_space<vmem>>, vector<16x32xf32>
    %4 = vector.shape_cast %3 : vector<16x32xf32> to vector<1x16x32xf32>
    %5 = vector.broadcast %4 : vector<1x16x32xf32> to vector<2x16x32xf32>
    %6 = arith.mulf %2, %5 : vector<2x16x32xf32>
    %c0_4 = arith.constant 0 : index
    %c0_5 = arith.constant 0 : index
    %7 = vector.load %arg3[%c0_4, %c0_5] : memref<16x32xf32, #tpu.memory_space<vmem>>, vector<16x32xf32>
    %8 = vector.shape_cast %7 : vector<16x32xf32> to vector<1x16x32xf32>
    %9 = vector.broadcast %8 : vector<1x16x32xf32> to vector<2x16x32xf32>
    %10 = arith.addf %6, %9 : vector<2x16x32xf32>
    %11 = vector.shape_cast %10 : vector<2x16x32xf32> to vector<32x32xf32>
    %12 = arith.truncf %11 : vector<32x32xf32> to vector<32x32xbf16>
    %c0_6 = arith.constant 0 : index
    %c0_7 = arith.constant 0 : index
    %13 = vector.load %arg7[%c0_6, %c0_7] : memref<32x64xbf16, #tpu.memory_space<vmem>>, vector<32x64xbf16>
    %cst = arith.constant dense<0.000000e+00> : vector<32x64xf32>
    %14 = tpu.matmul %1, %13, %cst {dimension_numbers = #tpu.dot_dimension_numbers<[1], [0], [0], [1], [0, 0, 1, 1], [], []>} : vector<32x32xbf16>, vector<32x64xbf16>, vector<32x64xf32> -> vector<32x64xf32>
    %c0_8 = arith.constant 0 : index
    %c0_9 = arith.constant 0 : index
    %15 = vector.load %arg8[%c0_8, %c0_9] : memref<1x64xf32, #tpu.memory_space<vmem>>, vector<1x64xf32>
    %16 = vector.broadcast %15 : vector<1x64xf32> to vector<32x64xf32>
    %17 = arith.addf %14, %16 : vector<32x64xf32>
    %c0_10 = arith.constant 0 : index
    %c0_11 = arith.constant 0 : index
    %18 = vector.load %arg4[%c0_10, %c0_11] : memref<32x128xbf16, #tpu.memory_space<vmem>>, vector<32x128xbf16>
    %cst_12 = arith.constant dense<0.000000e+00> : vector<32x128xf32>
    %19 = tpu.matmul %12, %18, %cst_12 {dimension_numbers = #tpu.dot_dimension_numbers<[1], [0], [0], [1], [0, 0, 1, 1], [], []>} : vector<32x32xbf16>, vector<32x128xbf16>, vector<32x128xf32> -> vector<32x128xf32>
    %c0_13 = arith.constant 0 : index
    %c0_14 = arith.constant 0 : index
    %20 = vector.load %arg5[%c0_13, %c0_14] : memref<1x128xf32, #tpu.memory_space<vmem>>, vector<1x128xf32>
    %21 = vector.broadcast %20 : vector<1x128xf32> to vector<32x128xf32>
    %22 = arith.addf %19, %21 : vector<32x128xf32>
    %cst_15 = arith.constant 0.000000e+00 : f32
    %23 = vector.broadcast %cst_15 : f32 to vector<32x128xf32>
    %24 = arith.maximumf %22, %23 : vector<32x128xf32>
    %25 = arith.truncf %24 : vector<32x128xf32> to vector<32x128xbf16>
    %c0_16 = arith.constant 0 : index
    %c0_17 = arith.constant 0 : index
    %26 = vector.load %arg6[%c0_16, %c0_17] : memref<128x64xbf16, #tpu.memory_space<vmem>>, vector<128x64xbf16>
    %cst_18 = arith.constant dense<0.000000e+00> : vector<32x64xf32>
    %27 = tpu.matmul %25, %26, %cst_18 {dimension_numbers = #tpu.dot_dimension_numbers<[1], [0], [0], [1], [0, 0, 1, 1], [], []>} : vector<32x128xbf16>, vector<128x64xbf16>, vector<32x64xf32> -> vector<32x64xf32>
    %28 = arith.addf %17, %27 : vector<32x64xf32>
    %29 = vector.shape_cast %28 : vector<32x64xf32> to vector<2x16x64xf32>
    %c0_19 = arith.constant 0 : index
    %c0_20 = arith.constant 0 : index
    %c0_21 = arith.constant 0 : index
    %30 = vector.load %arg9[%c0_19, %c0_20, %c0_21] : memref<2x16x64xf32, #tpu.memory_space<vmem>>, vector<2x16x64xf32>
    tpu.vector_store %arg9[%c0_19, %c0_20, %c0_21], %29 {strides = array<i32>} : memref<2x16x64xf32, #tpu.memory_space<vmem>>, vector<2x16x64xf32>,
    return
  }
  func.func @transform_0(%arg0: i32) -> (i32, i32, i32) {
    %c0_i32 = arith.constant 0 : i32
    %c0_i32_0 = arith.constant 0 : i32
    %c0_i32_1 = arith.constant 0 : i32
    return %arg0, %c0_i32, %c0_i32_0 : i32, i32, i32
  }
  func.func @transform_1(%arg0: i32) -> (i32, i32) {
    %c0_i32 = arith.constant 0 : i32
    %c0_i32_0 = arith.constant 0 : i32
    %c0_i32_1 = arith.constant 0 : i32
    return %c0_i32, %c0_i32_0 : i32, i32
  }
  func.func @transform_2(%arg0: i32) -> (i32, i32) {
    %c0_i32 = arith.constant 0 : i32
    %c0_i32_0 = arith.constant 0 : i32
    %c0_i32_1 = arith.constant 0 : i32
    return %c0_i32, %c0_i32_0 : i32, i32
  }
  func.func @transform_3(%arg0: i32) -> (i32, i32) {
    %c0_i32 = arith.constant 0 : i32
    %c0_i32_0 = arith.constant 0 : i32
    %c0_i32_1 = arith.constant 0 : i32
    return %c0_i32, %c0_i32_0 : i32, i32
  }
  func.func @transform_4(%arg0: i32) -> (i32, i32) {
    %c0_i32 = arith.constant 0 : i32
    %c0_i32_0 = arith.constant 0 : i32
    %c0_i32_1 = arith.constant 0 : i32
    return %c0_i32, %c0_i32_0 : i32, i32
  }
  func.func @transform_5(%arg0: i32) -> (i32, i32) {
    %c0_i32 = arith.constant 0 : i32
    %c0_i32_0 = arith.constant 0 : i32
    %c0_i32_1 = arith.constant 0 : i32
    return %c0_i32, %c0_i32_0 : i32, i32
  }
  func.func @transform_6(%arg0: i32) -> (i32, i32) {
    %c0_i32 = arith.constant 0 : i32
    %c0_i32_0 = arith.constant 0 : i32
    %c0_i32_1 = arith.constant 0 : i32
    return %c0_i32, %c0_i32_0 : i32, i32
  }
  func.func @transform_7(%arg0: i32) -> (i32, i32) {
    %c0_i32 = arith.constant 0 : i32
    %c0_i32_0 = arith.constant 0 : i32
    %c0_i32_1 = arith.constant 0 : i32
    return %c0_i32, %c0_i32_0 : i32, i32
  }
  func.func @transform_8(%arg0: i32) -> (i32, i32, i32) {
    %c0_i32 = arith.constant 0 : i32
    %c0_i32_0 = arith.constant 0 : i32
    %c0_i32_1 = arith.constant 0 : i32
    return %arg0, %c0_i32, %c0_i32_0 : i32, i32, i32
  }
}

</mosaic_0001>

<bundles_post_ra>
// kernel: tpu_custom_call.1
= control target key start
LH: loop header
LB: loop body
LE: loop exit
PB: predicated region body
PF: predicated region fallthrough
CT: control target
= control target key end

     0   :  { %13 = vsyncpa [#allocation3], 0  ;;  %s1016_s0 = inlined_call_operand.vmem [shape: bf16[4,16,32], index: 0, kind: input, shape index: {}]   ;;  %s1017_s1 = inlined_call_operand.vmem [shape: f32[16,32], index: 1, kind: input, shape index: {}]   ;;  %s1018_s2 = inlined_call_operand.vmem [shape: f32[16,32], index: 2, kind: input, shape index: {}]   ;;  %s1019_s3 = inlined_call_operand.vmem [shape: bf16[32,128], index: 3, kind: input, shape index: {}]   ;;  %s1020_s4 = inlined_call_operand.vmem [shape: f32[1,128], index: 4, kind: input, shape index: {}]   ;;  %s1021_s5 = inlined_call_operand.vmem [shape: bf16[128,64], index: 5, kind: input, shape index: {}]   ;;  %s1022_s6 = inlined_call_operand.vmem [shape: bf16[32,64], index: 6, kind: input, shape index: {}]   ;;  %s1023_s7 = inlined_call_operand.vmem [shape: f32[1,64], index: 7, kind: input, shape index: {}]   ;;  %s1024_s8 = inlined_call_operand.hbm [shape: f32[4,16,64], index: 8, kind: output, shape index: {}]  }
   0x1   :  { %15 = vsyncpa [#allocation3 + $0x1], 0  ;;  %s864_s27 = smov 0   ;;  %s866_s28 = smov 0  }
   0x2   :  { %s868_s29 = smov 0   ;;  %s870_s30 = smov 0  }
   0x3 LB: > { %s885_s9 = sadd.s32 4294967295, %s815_s30   ;;  %s611_s10 = sadd.s32 4294967294, %s815_s30   ;;  %s815_s30 = sphi %s870_s30, %s1030_s30   ;;  %s811_s29 = sphi %s868_s29, %s1029_s29   ;;  %s807_s28 = sphi %s866_s28, %s1028_s28   ;;  %s803_s27 = sphi %s864_s27, %s1027_s27  }
   0x4   : > { %s889_s11 = sadd.s32 1, %s815_s30   ;;  %s201_s12 = sadd.s32 1, %s811_s29 }
   0x5   : > { %s198_s13 = ssub.s32 %s815_s30, %s889_s11  ;;  %p211_p0 = scmp.ne.s32.totalorder %s811_s29, %s807_s28 }
   0x6   : > { %p199_p1 = scmp.eq.s32.totalorder %s198_s13, 0  ;;  %p212_p2 = scmp.eq.s32.totalorder %s885_s9, 1 }
   0x7   : > { %p217_p3 = scmp.ne.s32.totalorder %s807_s28, %s803_s27  ;;  %p218_p4 = scmp.eq.s32.totalorder %s611_s10, 1 }
   0x8   : > { %s900_s14 = scalar_select %p199_p1, %s811_s29, %s201_s12  }
   0x9   : > { %p902_p5 = por %p212_p2, %p211_p0  ;;  %p906_p6 = por %p218_p4, %p217_p3 }
   0xa   : > { %p614_p7 = scmp.ge.s32.totalorder %s815_s30, 1  ;;  %p267_p8 = scmp.lt.s32.totalorder %s815_s30, 3 }
   0xc   : > { %p268_p9 = pnand %p614_p7, %p267_p8 }
   0xd   : > { %s616_s19 = sshll.u32 (!%p268_p9), %s885_s9, 1  ;;  %s299_s21 = sand.u32 (!%p268_p9), 1, %s807_s28  }
   0xe   : > { %271 = sbr.rel (%p268_p9) target bundleno = 333 (0x14d), region = 52  ;;  %p303_p10 = scmp.lt.s32.totalorder (!%p268_p9), %s616_s19, 3 }
   0xf   : > { %s701_s23 = sshll.u32 (!%p268_p9), %s885_s9, 5  ;;  %s533_s9 = scalar_lea.sflag (!%p268_p9), [#allocation3], %s299_s21 }
  0x13   : > { %v691_v0 = vld [vmem:[%s1019_s3 + $0x8] sm:$0xff]  ;;  %v690_v1 = vld [vmem:[%s1019_s3] sm:$0xff]  ;;  %v699_v2 = vld [vmem:[%s1021_s5 + $0x38] sm:$0xff]  ;;  %s1032_s19 = smov (!%p303_p10, %s616_s19), 3  ;;  %vm363_vm0 = vcmask 261120   ;;  %vm527_vm1 = vcmask 523264  }
  0x14   : > { %421 = vmatpush.bf16.msra.mxu1 %v691_v0  ;;  %504 = vmatpush.bf16.msra.mxu2 %v699_v2  ;;  %v698_v3 = vld [vmem:[%s1021_s5 + $0x30] sm:$0xff]  ;;  %s685_s26 = sshll.u32 %s1032_s19, 3  ;;  %v319_v5 = vld [vmem:[%s1017_s1] sm:$0xff]  ;;  %v320_v6 = vld [vmem:[%s1017_s1 + $0x8] sm:$0xff]  ;;  %s615_s19 = sshll.u32 %s299_s21, 5 }
  0x15   : > { %702 = vmatpush.bf16.msra.mxu3 %v699_v2  ;;  %s928_s13 = scalar_lea.vmem %s1016_s0, %s685_s26  ;;  %v697_v9 = vld [vmem:[%s1021_s5 + $0x28] sm:$0xff]  ;;  %v325_v10 = vld [vmem:[%s1018_s2] sm:$0xff]  ;;  %v695_v26 = vld [vmem:[%s1021_s5 + $0x18] sm:$0xff]  ;;  %s301_s22 = scalar_lea.vmem [#allocation2], %s615_s19 }
  0x16   : > { %v311_v4 = vld [vmem:[%s928_s13] sm:$0xff]   ;;  %v326_v11 = vld [vmem:[%s1018_s2 + $0x8] sm:$0xff]  ;;  %v694_v28 = vld [vmem:[%s1021_s5 + $0x10] sm:$0xff]  ;;  %s545_s26 = scalar_lea.hbm %s1024_s8, %s701_s23  ;;  %s546_s10 = sshll.u32 %s301_s22, 4  ;;  %s547_s10 = int_to_ptr.vmem [resolvable:$true] %s546_s10 }
  0x17   : > { %v315_v7 = vunpack.c.l.bf16 %v311_v4  ;;  %v316_v8 = vunpack.c.h.bf16 %v311_v4  ;;  %v696_v16 = vld [vmem:[%s1021_s5 + $0x20] sm:$0xff]  ;;  %v313_v17 = vld [vmem:[%s928_s13 + $0x8] sm:$0xff]   ;;  %s548_s12 = sshll.u32 %s545_s26, 4  ;;  %s773_s19 = scalar_lea.hbm %s1024_s8, 64  ;;  %s549_s12 = int_to_ptr.hbm [resolvable:$true] %s548_s12 }
  0x18   : > { %422 = vmatpush.bf16.msra.mxu1 %v690_v1  ;;  %505 = vmatpush.bf16.msra.mxu2 %v698_v3  ;;  %v317_v19 = vunpack.c.l.bf16 %v313_v17  ;;  %v318_v20 = vunpack.c.h.bf16 %v313_v17  ;;  %v689_v27 = vld [vmem:[%s1022_s6 + $0x8] sm:$0xff]  ;;  %v688_v29 = vld [vmem:[%s1022_s6] sm:$0xff]  ;;  %s767_s17 = sshra.s32 %s549_s12, 4  ;;  %s768_s17 = int_to_ptr.hbm [resolvable:$true] %s767_s17 }
  0x19   : > { %703 = vmatpush.bf16.msra.mxu3 %v698_v3  ;;  %v321_v12 = vmul.f32 %v319_v5, %v315_v7  ;;  %v322_v13 = vmul.f32 %v320_v6, %v316_v8  ;;  %376 = vmatpush.bf16.msra.mxu0 %v689_v27  ;;  %v693_v30 = vld [vmem:[%s1021_s5 + $0x8] sm:$0xff]  ;;  %v686_v31 = vld [vmem:[%s928_s13] sm:$0xff]  ;;  %s769_s18 = scalar_lea.hbm %s768_s17, 32  ;;  %p774_p0 = scmp.lt.s32.totalorder %s768_s17, %s1024_s8 }
  0x1a   : > { %v323_v21 = vmul.f32 %v319_v5, %v317_v19  ;;  %v324_v22 = vmul.f32 %v320_v6, %v318_v20  ;;  %v692_v32 = vld [vmem:[%s1021_s5] sm:$0xff]  ;;  %v687_v33 = vld [vmem:[%s928_s13 + $0x8] sm:$0xff]  ;;  %p770_p11 = scmp.ne.s32.totalorder %s768_s17, %s769_s18  ;;  %p775_p1 = scmp.lt.s32.totalorder %s773_s19, %s769_s18 }
  0x1b   : > { %v327_v14 = vadd.f32 %v325_v10, %v321_v12  ;;  %v328_v15 = vadd.f32 %v326_v11, %v322_v13  ;;  %v751_v35 = vld [vmem:[%s1020_s4] ss:$0 sm:$0xff] }
  0x1c   : > { %506 = vmatpush.bf16.msra.mxu2 %v697_v9  ;;  %v329_v23 = vadd.f32 %v325_v10, %v323_v21  ;;  %v330_v24 = vadd.f32 %v326_v11, %v324_v22  ;;  %v752_v50 = vld [vmem:[%s1023_s7] ss:$0 sm:$0xff]  ;;  %p771_p12 = pnand %p770_p11, %p902_p5  ;;  %p776_p2 = por %p775_p1, %p774_p0 }
  0x1d   : > { %704 = vmatpush.bf16.msra.mxu3 %v697_v9  ;;  %v331_v18 = vpack.c.bf16 %v328_v15, %v327_v14  ;;  %377 = vmatpush.bf16.msra.mxu0 %v688_v29 }
  0x1e   : > { %v332_v25 = vpack.c.bf16 %v330_v24, %v329_v23  ;;  %p772_p13 = pneg %p771_p12 }
  0x1f   : > { %645 = vmatmul.msk.bf16.vlgmr.msra.gmra.mxu1 %vm363_vm0, %v331_v18 }
  0x20   : > { %507 = vmatpush.bf16.msra.mxu2 %v696_v16  ;;  %635 = vmatmul.msk.bf16.vlgmr.msra.gmra.mxu0 %vm363_vm0, %v686_v31  ;;  %p777_p3 = pnand %p776_p2, %p772_p13 }
  0x21   : > { %705 = vmatpush.bf16.msra.mxu3 %v696_v16 }
  0x24   : > { %508 = vmatpush.bf16.msra.mxu2 %v695_v26 }
  0x25   : > { %706 = vmatpush.bf16.msra.mxu3 %v695_v26 }
  0x28   : > { %509 = vmatpush.bf16.msra.mxu2 %v694_v28 }
  0x29   : > { %707 = vmatpush.bf16.msra.mxu3 %v694_v28 }
  0x2c   : > { %510 = vmatpush.bf16.msra.mxu2 %v693_v30 }
  0x2d   : > { %708 = vmatpush.bf16.msra.mxu3 %v693_v30 }
  0x2f   : > { %646 = vmatmul.msk.bf16.gmra.mxu1 %vm363_vm0, %v332_v25 }
  0x30   : > { %511 = vmatpush.bf16.msra.mxu2 %v692_v32  ;;  %636 = vmatmul.msk.bf16.gmra.mxu0 %vm363_vm0, %v687_v33 }
  0x31   : > { %709 = vmatpush.bf16.msra.mxu3 %v692_v32 }
  0x9c   : > { %v424_v34 = vpop.f32.mrf.mxu1 }
  0x9d   : > { %v425_v36 = vadd.f32 %v751_v35, %v424_v34  ;;  %v379_v49 = vpop.f32.mrf.mxu0 }
  0x9e   : > { %v380_v51 = vadd.f32 %v752_v50, %v379_v49 }
  0x9f   : > { %v434_v39 = vmax.f32 %v425_v36, 0.0 }
  0xa4   : > { %v426_v37 = vpop.f32.mrf.mxu1 }
  0xa5   : > { %v427_v38 = vadd.f32 %v751_v35, %v426_v37  ;;  %v381_v52 = vpop.f32.mrf.mxu0 }
  0xa6   : > { %v382_v55 = vadd.f32 %v752_v50, %v381_v52 }
  0xa7   : > { %v435_v40 = vmax.f32 %v427_v38, 0.0 }
  0xa9   : > { %v438_v41 = vpack.c.bf16 %v435_v40, %v434_v39 }
  0xab   : > { %512 = vmatmul.bf16.vlgmr.msra.gmra.mxu2 %v438_v41 }
  0xac   : > { %v429_v42 = vpop.f32.mrf.mxu1 }
  0xad   : > { %v430_v43 = vadd.f32 %v751_v35, %v429_v42  ;;  %v384_v58 = vpop.f32.mrf.mxu0 }
  0xae   : > { %v385_v59 = vadd.f32 %v752_v50, %v384_v58 }
  0xaf   : > { %v436_v46 = vmax.f32 %v430_v43, 0.0 }
  0xb4   : > { %v431_v44 = vpop.f32.mrf.mxu1 }
  0xb5   : > { %v432_v45 = vadd.f32 %v751_v35, %v431_v44  ;;  %v386_v62 = vpop.f32.mrf.mxu0 }
  0xb6   : > { %v387_v63 = vadd.f32 %v752_v50, %v386_v62 }
  0xb7   : > { %v437_v47 = vmax.f32 %v432_v45, 0.0 }
  0xb9   : > { %v439_v48 = vpack.c.bf16 %v437_v47, %v436_v46 }
  0xbb   : > { %517 = vmatmul.bf16.vlgmr.msra.gmra.mxu3 %v439_v48 }
 0x12e   : > { %v513_v53 = vpop.f32.mrf.mxu2 }
 0x12f   : > { %v523_v54 = vadd.f32 %v513_v53, %v380_v51 }
 0x131   : > { %528 = vst.msk [vmem:[%s301_s22] sm:$0xff] %vm527_vm1, %v523_v54 }
 0x136   : > { %v515_v56 = vpop.f32.mrf.mxu2 }
 0x137   : > { %v524_v57 = vadd.f32 %v515_v56, %v382_v55 }
 0x139   : > { %529 = vst.msk [vmem:[%s301_s22 + $0x8] sm:$0xff] %vm527_vm1, %v524_v57 }
 0x13e   : > { %v518_v60 = vpop.f32.mrf.mxu3 }
 0x13f   : > { %v525_v61 = vadd.f32 %v518_v60, %v385_v59 }
 0x141   : > { %530 = vst.msk [vmem:[%s301_s22 + $0x10] sm:$0xff] %vm527_vm1, %v525_v61 }
 0x146   : > { %v520_v0 = vpop.f32.mrf.mxu3 }
 0x147   : > { %v526_v1 = vadd.f32 %v520_v0, %v387_v63 }
 0x149   : > { %531 = vst.msk [vmem:[%s301_s22 + $0x18] sm:$0xff] %vm527_vm1, %v526_v1 }
 0x14a   : > { %780 = shalt.err (!%p777_p3)
}
 0x14b   : > { %s817_s21 = smov 128   ;;  %s818_s22 = smov 8  }
 0x14c   : > { %710 = dma.vmem_to_hbm [thread:$0]  (%p902_p5), %s547_s10, 512, %s549_s12, %s533_s9, %s817_s21, %s817_s21, %s818_s22  }
 0x14d PF: > { %p716_p4 = scmp.ge.s32.totalorder %s815_s30, 2  ;;  %s563_s25 = sand.u32 1, %s803_s27  }
 0x14e   : > { %s564_s26 = scalar_lea.sflag [#allocation3], %s563_s25 }
 0x14f   : > { %p713_p7 = pnand %p716_p4, %p906_p6 }
 0x151   : > { %p714_p8 = pneg %p713_p7 }
 0x153   : > { %798 = dma.done.wait (%p714_p8), %s564_s26, 512  }
 0x154   : > { %800 = vsyncadd (%p714_p8), %s564_s26, 4294966784  ;;  %p18_p9 = scmp.ge.s32.totalorder %s889_s11, 4   ;;  %s1027_s27 = smov %s807_s28 }
 0x155   : > { %s1028_s28 = smov %s811_s29  ;;  %s1029_s29 = smov %s900_s14 }
 0x156   : > { %s1030_s30 = smov %s889_s11  ;;  %20 = sbr.rel (!%p18_p9) target bundleno = 3 (0x3), region = 87 }
 0x15b   :  { %570 = vsyncpa [#allocation3], 1 }
 0x15c   :  { %572 = vsyncpa [#allocation3 + $0x1], 1 }

</bundles_post_ra>
